<compile_context>
chip_gen: v6e
topology: v6e:2x2x1
jax: 0.10.0
libtpu: 0.0.40
codegen_flags: <defaults>
</compile_context>

<pallas_src>
import jax
import jax.numpy as jnp
from jax.experimental import pallas as pl
from jax.experimental.pallas import tpu as pltpu


def _round_up(n: int, m: int) -> int:
    return ((n + m - 1) // m) * m


def residual_add_kernel(x_ref, w_ref, b_ref, o_ref):
    # x_ref: (TM, H) input dtype   w_ref: (H, H) dot dtype (bf16 or f32)
    # b_ref: (1, H) f32            o_ref: (TM, H) input dtype
    x = x_ref[...]
    # fn(x): Linear.  MXU matmul in the weight dtype, f32 accumulation.
    y = jnp.dot(x.astype(w_ref.dtype), w_ref[...],
                preferred_element_type=jnp.float32)
    # Bias + residual epilogue in f32 (v5e VPU has no bf16 ALUs), one cast out.
    o_ref[...] = (y + b_ref[...] + x.astype(jnp.float32)).astype(o_ref.dtype)


def residual_add(x, w, b, *, tm: int = 512, dot_dtype=jnp.bfloat16):
    """ResidualAdd(Linear): x: (B, S, H), w: (H, H), b: (H,) -> (B, S, H)."""
    B, S, H = x.shape
    M = B * S

    # No padding of the big operand: reshape is a bitcast, grid masks ragged M,
    # and H uses the "block dim == full array dim" exception when H % 128 != 0
    # (masked vst in the epilogue is cheaper than two extra HBM passes).
    x2 = x.reshape(M, H)
    wp = w.astype(dot_dtype)                      # tiny; resident in VMEM
    bp = b.astype(jnp.float32).reshape(1, H)      # tiny; resident in VMEM

    x_itemsize = jnp.dtype(x.dtype).itemsize
    w_itemsize = jnp.dtype(dot_dtype).itemsize

    # Per-generation VMEM cap: 128 MiB physical on v5e/v6e, 64 MiB/TC on v7x.
    try:
        vmem_cap = int(pltpu.get_tpu_info().vmem_capacity_bytes)
    except Exception:  # conservative fallback if query unavailable
        vmem_cap = 64 << 20
    vmem_cap = max(vmem_cap - (16 << 20), 16 << 20)   # headroom, hedge once

    def vmem_needed(tm_rows: int) -> int:
        return (2 * tm_rows * H * x_itemsize       # x tiles, double-buffered
                + 2 * tm_rows * H * x_itemsize     # out tiles, double-buffered
                + H * H * w_itemsize               # W, single buffer
                + H * 4                            # bias, single buffer
                + (2 << 20))                       # compiler scratch headroom

    # Largest row tile up to `tm`, multiple of 8; shrink only if VMEM-bound.
    TM = max(8, min(_round_up(tm, 8), _round_up(M, 8)))
    while TM > 8 and vmem_needed(TM) > vmem_cap:
        TM = max(8, _round_up(TM // 2, 8))
    # TODO(synk): if W alone exceeds the VMEM cap (H >~ 4-5K bf16 on v7x's
    # 64 MiB/TC), fall back to an N-column-tiled grid (resident W column block
    # across an inner M loop) instead of this resident-whole-W design.

    # v7x megacore: keep at least 2 M-tiles when possible so both TensorCores
    # get work under dimension_semantics=("parallel",).
    if pl.cdiv(M, TM) < 2 and M > 8:
        TM = max(8, _round_up(pl.cdiv(M, 2), 8))

    grid = (pl.cdiv(M, TM),)
    vmem_limit = int(min(max(vmem_needed(TM), 8 << 20), vmem_cap))

    out = pl.pallas_call(
        residual_add_kernel,
        out_shape=jax.ShapeDtypeStruct((M, H), x.dtype),
        grid_spec=pltpu.PrefetchScalarGridSpec(
            num_scalar_prefetch=0,
            grid=grid,
            in_specs=[
                # x: streamed over M, default double-buffered pipeline.
                pl.BlockSpec((TM, H), lambda i: (i, 0)),
                # W / b: constant index map -> resident, single-buffered
                # (a second pipeline buffer would be pure VMEM waste).
                pl.BlockSpec((H, H), lambda i: (0, 0),
                             pipeline_mode=pl.Buffered(1)),
                pl.BlockSpec((1, H), lambda i: (0, 0),
                             pipeline_mode=pl.Buffered(1)),
            ],
            out_specs=pl.BlockSpec((TM, H), lambda i: (i, 0)),
        ),
        compiler_params=pltpu.CompilerParams(
            dimension_semantics=("parallel",),   # M-tiles independent
            vmem_limit_bytes=vmem_limit,
        ),
    )(x2, wp, bp)

    return out.reshape(B, S, H)


def reference(x, w, b):
    return jnp.einsum("bsh,hk->bsk", x, w) + b + x


if __name__ == "__main__":
    key = jax.random.PRNGKey(0)
    kx, kw, kb = jax.random.split(key, 3)

    B, S, H = 2, 8, 32
    x = jax.random.normal(kx, (B, S, H), dtype=jnp.float32)
    # Deterministic "fn" parameters (Linear H->H), i.e. the module ResidualAdd wraps.
    w = jax.random.normal(kw, (H, H), dtype=jnp.float32) * 0.02
    b = jax.random.normal(kb, (H,), dtype=jnp.float32) * 0.01

    ref = reference(x, w, b)

    # Exact (f32 MXU) configuration: tight tolerance.
    out_f32 = residual_add(x, w, b, dot_dtype=jnp.float32)
    jax.block_until_ready(out_f32)
    assert out_f32.shape == (B, S, H)
    assert jnp.allclose(out_f32, ref, atol=1e-5, rtol=1e-5), "f32 path mismatch"

    # Default production configuration (bf16 MXU dot, f32 epilogue): looser
    # tolerance reflects the bf16 matmul rounding.
    out_bf16 = residual_add(x, w, b)
    jax.block_until_ready(out_bf16)
    assert out_bf16.shape == (B, S, H)
    assert jnp.allclose(out_bf16, ref, atol=2e-2, rtol=2e-2), "bf16 path mismatch"

    print("KERNEL_OK")
</pallas_src>

<mosaic_0001>
module attributes {stable_mosaic.version = 11 : i64} {
  func.func @residual_add_kernel(%arg0: i32, %arg1: memref<8x32xf32, #tpu.memory_space<vmem>>, %arg2: memref<32x32xf32, #tpu.memory_space<vmem>>, %arg3: memref<1x32xf32, #tpu.memory_space<vmem>>, %arg4: memref<8x32xf32, #tpu.memory_space<vmem>>) attributes {dimension_semantics = [#tpu.dimension_semantics<parallel>], iteration_bounds = array<i64: 2>, scalar_prefetch = 0 : i64, scratch_operands = 0 : i64, tpu.core_type = #tpu.core_type<tc>, window_params = [{transform_indices = @transform_0, window_bounds = array<i64: 8, 32>}, {pipeline_mode = #tpu.pipeline_mode<synchronous>, transform_indices = @transform_1, window_bounds = array<i64: 32, 32>}, {pipeline_mode = #tpu.pipeline_mode<synchronous>, transform_indices = @transform_2, window_bounds = array<i64: 1, 32>}, {transform_indices = @transform_3, window_bounds = array<i64: 8, 32>}]} {
    %c0 = arith.constant 0 : index
    %c0_0 = arith.constant 0 : index
    %0 = vector.load %arg1[%c0, %c0_0] : memref<8x32xf32, #tpu.memory_space<vmem>>, vector<8x32xf32>
    %c0_1 = arith.constant 0 : index
    %c0_2 = arith.constant 0 : index
    %1 = vector.load %arg2[%c0_1, %c0_2] : memref<32x32xf32, #tpu.memory_space<vmem>>, vector<32x32xf32>
    %cst = arith.constant dense<0.000000e+00> : vector<8x32xf32>
    %2 = tpu.matmul %0, %1, %cst {dimension_numbers = #tpu.dot_dimension_numbers<[1], [0], [0], [1], [0, 0, 1, 1], [], []>} : vector<8x32xf32>, vector<32x32xf32>, vector<8x32xf32> -> vector<8x32xf32>
    %c0_3 = arith.constant 0 : index
    %c0_4 = arith.constant 0 : index
    %3 = vector.load %arg3[%c0_3, %c0_4] : memref<1x32xf32, #tpu.memory_space<vmem>>, vector<1x32xf32>
    %4 = vector.broadcast %3 : vector<1x32xf32> to vector<8x32xf32>
    %5 = arith.addf %2, %4 : vector<8x32xf32>
    %6 = arith.addf %5, %0 : vector<8x32xf32>
    %c0_5 = arith.constant 0 : index
    %c0_6 = arith.constant 0 : index
    %7 = vector.load %arg4[%c0_5, %c0_6] : memref<8x32xf32, #tpu.memory_space<vmem>>, vector<8x32xf32>
    tpu.vector_store %arg4[%c0_5, %c0_6], %6 {strides = array<i32>} : memref<8x32xf32, #tpu.memory_space<vmem>>, vector<8x32xf32>,
    return
  }
  func.func @transform_0(%arg0: i32) -> (i32, i32) {
    %c0_i32 = arith.constant 0 : i32
    %c0_i32_0 = arith.constant 0 : i32
    return %arg0, %c0_i32 : i32, i32
  }
  func.func @transform_1(%arg0: i32) -> (i32, i32) {
    %c0_i32 = arith.constant 0 : i32
    %c0_i32_0 = arith.constant 0 : i32
    %c0_i32_1 = arith.constant 0 : i32
    return %c0_i32, %c0_i32_0 : i32, i32
  }
  func.func @transform_2(%arg0: i32) -> (i32, i32) {
    %c0_i32 = arith.constant 0 : i32
    %c0_i32_0 = arith.constant 0 : i32
    %c0_i32_1 = arith.constant 0 : i32
    return %c0_i32, %c0_i32_0 : i32, i32
  }
  func.func @transform_3(%arg0: i32) -> (i32, i32) {
    %c0_i32 = arith.constant 0 : i32
    %c0_i32_0 = arith.constant 0 : i32
    return %arg0, %c0_i32 : i32, i32
  }
}

</mosaic_0001>

<bundles_post_ra>
// kernel: tpu_custom_call.1
= control target key start
LH: loop header
LB: loop body
LE: loop exit
PB: predicated region body
PF: predicated region fallthrough
CT: control target
= control target key end

     0   :  { %8 = vsyncpa [#allocation3], 0  ;;  %s784_s0 = inlined_call_operand.hbm [shape: f32[16,32], index: 0, kind: input, shape index: {}]   ;;  %s785_s1 = inlined_call_operand.hbm [shape: f32[32,32], index: 1, kind: input, shape index: {}]   ;;  %s786_s2 = inlined_call_operand.vmem [shape: f32[1,32], index: 2, kind: input, shape index: {}]   ;;  %s787_s3 = inlined_call_operand.hbm [shape: f32[16,32], index: 3, kind: output, shape index: {}]  }
   0x1   :  { %10 = vsyncpa [#allocation3 + $0x1], 0 }
   0x2   :  { %11 = vsyncpa [#allocation6], 0 }
   0x3   :  { %12 = vsyncpa [#allocation4], 0 }
   0x4   :  { %14 = vsyncpa [#allocation4 + $0x1], 0  ;;  %s627_s12 = smov 0   ;;  %s629_s13 = smov 0  }
   0x5   :  { %s631_s14 = smov 0   ;;  %s633_s15 = smov 0  }
   0x6 LB: > { %s648_s16 = sadd.s32 4294967295, %s598_s15   ;;  %s383_s17 = sadd.s32 4294967294, %s598_s15   ;;  %s598_s15 = sphi %s633_s15, %s809_s15   ;;  %s594_s14 = sphi %s631_s14, %s808_s14   ;;  %s590_s13 = sphi %s629_s13, %s807_s13   ;;  %s586_s12 = sphi %s627_s12, %s806_s12  }
   0x7   : > { %p40_p0 = scmp.ne.s32.totalorder %s590_s13, %s586_s12  ;;  %p788_p1 = scmp.eq.s32.totalorder %s648_s16, 0 }
   0x8   : > { %p112_p3 = scmp.eq.s32.totalorder %s383_s17, 1  ;;  %p384_p5 = scmp.ge.s32.totalorder %s598_s15, 1 }
   0x9   : > { %p657_p4 = por %p788_p1, %p40_p0  ;;  %p119_p7 = scmp.lt.s32.totalorder %s598_s15, 3 }
   0xa   : > { %p662_p6 = por %p112_p3, %p40_p0  ;;  %s600_s21 = smov [#allocation5]  }
   0xb   : > { %s792_s18 = scalar_select %p657_p4, 1, 0 }
   0xc   : > { %s793_s19 = scalar_select %p662_p6, 1, 0 }
   0xd   : > { %p667_p8 = pnand %p384_p5, %p119_p7  ;;  %s131_s22 = sshll.u32 %s600_s21, 4  ;;  %s132_s22 = int_to_ptr.vmem [resolvable:$true] %s131_s22 }
   0xe   : > { %s681_s24 = sadd.s32 1, %s598_s15   ;;  %s27_s25 = sadd.s32 1, %s594_s14 }
   0xf   : > { %s794_s20 = scalar_select %p667_p8, 1, 0 }
  0x10   : > { %p423_p9 = pneg %p667_p8  ;;  %s24_s26 = ssub.s32 %s598_s15, %s681_s24 }
  0x11   : > { %s487_s27 = scalar_lea.vmem %s132_s22, 512  ;;  %p495_p5 = scmp.lt.s32.totalorder %s132_s22, %s132_s22 }
  0x12   : > { %p676_p11 = pnand %p423_p9, %p788_p1  ;;  %p488_p13 = scmp.ne.s32.totalorder %s132_s22, %s487_s27 }
  0x13   : > { %p496_p7 = scmp.lt.s32.totalorder %s487_s27, %s487_s27 }
  0x14   : > { %p478_p12 = pneg %p676_p11 }
  0x15   : > { %p497_p10 = por %p496_p7, %p495_p5 }
  0x16   : > { %p490_p0 = pnand %p488_p13, %p478_p12 }
  0x18   : > { %p491_p3 = pneg %p490_p0 }
  0x1a   : > { %p498_p2 = pnand %p497_p10, %p491_p3 }
  0x1c   : > { %501 = shalt.err (!%p498_p2)
}
  0x1d   : > { %s601_s28 = smov 128   ;;  %s602_s29 = smov 8  }
  0x1e   : > { %426 = dma.hbm_to_vmem [thread:$0]  (!%p676_p11), %s785_s1, 512, %s132_s22, [#allocation6], %s601_s28, %s601_s28, %s602_s29  }
  0x1f   : > { %p25_p9 = scmp.eq.s32.totalorder %s24_s26, 0  ;;  %p34_p12 = scmp.ne.s32.totalorder %s594_s14, %s590_s13 }
  0x20   : > { %p35_p10 = scmp.eq.s32.totalorder %s598_s15, 0  ;;  %p436_p2 = scmp.lt.s32.totalorder %s598_s15, 2 }
  0x21   : > { %s698_s5 = scalar_select %p25_p9, %s594_s14, %s27_s25  }
  0x22   : > { %p36_p13 = por %p35_p10, %p34_p12  ;;  %p796_p0 = scmp.eq.s32.totalorder %s648_s16, 1 }
  0x23   : > { %s148_s7 = sand.u32 1, %s594_s14   ;;  %s388_s8 = sshll.u32 %s598_s15, 7 }
  0x24   : > { %p702_p3 = por %p796_p0, %p34_p12  ;;  %s387_s9 = sshll.u32 %s148_s7, 3 }
  0x25   : > { %s711_s17 = scalar_lea.hbm %s784_s0, %s388_s8  ;;  %s152_s21 = scalar_lea.vmem [#allocation2], %s387_s9 }
  0x26   : > { %s797_s6 = scalar_select %p702_p3, 1, 0 }
  0x27   : > { %s159_s22 = sshll.u32 %s152_s21, 4  ;;  %p713_p11 = pnand %p436_p2, %p36_p13  ;;  %s160_s22 = int_to_ptr.vmem [resolvable:$true] %s159_s22 }
  0x28   : > { %s149_s25 = scalar_lea.sflag [#allocation3], %s148_s7  ;;  %s502_s26 = scalar_lea.hbm %s711_s17, 128 }
  0x29   : > { %p503_p5 = scmp.ne.s32.totalorder %s711_s17, %s502_s26  ;;  %p504_p7 = pneg %p713_p11 }
  0x2a   : > { %s507_s29 = scalar_lea.hbm %s784_s0, 256  ;;  %p508_p10 = scmp.lt.s32.totalorder %s711_s17, %s784_s0 }
  0x2b   : > { %p505_p9 = pnand %p504_p7, %p503_p5  ;;  %p509_p2 = scmp.lt.s32.totalorder %s507_s29, %s502_s26 }
  0x2d   : > { %p506_p12 = pneg %p505_p9  ;;  %p510_p13 = por %p509_p2, %p508_p10 }
  0x2f   : > { %p511_p0 = pnand %p510_p13, %p506_p12 }
  0x31   : > { %514 = shalt.err (!%p511_p0)
}
  0x32   : > { %s515_s8 = scalar_lea.vmem %s160_s22, 128  ;;  %s603_s7 = smov [#allocation2]  }
  0x33   : > { %p516_p1 = scmp.ne.s32.totalorder %s160_s22, %s515_s8  ;;  %s520_s9 = sshll.u32 %s603_s7, 4  ;;  %s521_s9 = int_to_ptr.vmem [resolvable:$false] %s520_s9 }
  0x34   : > { %s522_s10 = scalar_lea.vmem %s521_s9, 256  ;;  %p523_p5 = scmp.lt.s32.totalorder %s160_s22, %s521_s9 }
  0x35   : > { %p518_p6 = pnand %p516_p1, %p504_p7  ;;  %p524_p9 = scmp.lt.s32.totalorder %s522_s10, %s515_s8 }
  0x37   : > { %p519_p3 = pneg %p518_p6  ;;  %p525_p4 = por %p524_p9, %p523_p5 }
  0x39   : > { %p526_p8 = pnand %p525_p4, %p519_p3 }
  0x3b   : > { %529 = shalt.err (!%p526_p8)
}
  0x3c   : > { %430 = dma.hbm_to_vmem [thread:$0]  (!%p713_p11), %s711_s17, 128, %s160_s22, %s149_s25  }
  0x3d   : > { %p799_p12 = scmp.ne.s32.totalorder %s794_s20, 0 }
  0x3e   : > { %s734_s11 = sand.u32 (!%p799_p12), 1, %s590_s13   ;;  %p800_p1 = scmp.ne.s32.totalorder (!%p799_p12), %s792_s18, 0 }
  0x3f   : > { %168 = sbr.rel (%p799_p12) target bundleno = 291 (0x123), region = 32  ;;  %s390_s21 = sshll.u32 (!%p799_p12), %s734_s11, 3 }
  0x40   : > { %s171_s26 = scalar_lea.sflag (!%p799_p12), [#allocation3], %s734_s11  ;;  %s174_s27 = scalar_lea.vmem (!%p799_p12), [#allocation2], %s390_s21 }
  0x44   : > { %573 = dma.done.wait (%p800_p1), %s171_s26, 128  }
  0x45   : > { %575 = vsyncadd (%p800_p1), %s171_s26, 4294967168  ;;  %p801_p4 = scmp.eq.s32.totalorder %s648_s16, 0 }
  0x47   : > { %577 = dma.done.wait (%p801_p4), [#allocation6], 512   ;;  %p802_p6 = pmov %p801_p4 }
  0x48   : > { %v604_v0 = vmov 0.0   ;;  %vm605_vm0 = vmmov 0   ;;  %v205_v1 = vld [vmem:[#allocation5 + $0x18] sm:$0xff]  ;;  %v204_v2 = vld [vmem:[#allocation5 + $0x10] sm:$0xff]  ;;  %v203_v3 = vld [vmem:[#allocation5 + $0x8] sm:$0xff]  ;;  %vm213_vm1 = vcmask 261120  }
  0x49   : > { %579 = vsyncadd (%p802_p6), [#allocation6], 4294966784  ;;  %404 = vmatprep.subr.mxu0 %v604_v0  ;;  %412 = vmatprep.mubr.msk.f32.mxu0 %vm605_vm0, %v604_v0  ;;  %v202_v4 = vld [vmem:[#allocation5] sm:$0xff]  ;;  %v201_v5 = vld [vmem:[%s174_s27] sm:$0xff]  ;;  %s396_s17 = sshll.u32 %s648_s16, 7  ;;  %s200_s22 = scalar_lea.vmem [#allocation7], %s390_s21 }
  0x4a   : > { %405 = vmatpush3.msra.mxu0 %v205_v1  ;;  %v393_v6 = vld [vmem:[%s786_s2] ss:$0 sm:$0xff]  ;;  %s303_s23 = sshll.u32 %s200_s22, 4  ;;  %s301_s29 = scalar_lea.hbm %s787_s3, %s396_s17  ;;  %s304_s23 = int_to_ptr.vmem [resolvable:$true] %s303_s23 }
  0x4b   : > { %406 = vmatprep.subr.mxu0 %v604_v0  ;;  %s290_s30 = scalar_lea.sflag [#allocation4], %s734_s11  ;;  %s530_s4 = scalar_lea.vmem %s304_s23, 128 }
  0x4c   : > { %407 = vmatpush3.msra.mxu0 %v204_v2  ;;  %p531_p8 = scmp.ne.s32.totalorder %s304_s23, %s530_s4  ;;  %p803_p3 = scmp.ne.s32.totalorder %s797_s6, 0 }
  0x4d   : > { %408 = vmatprep.subr.mxu0 %v604_v0  ;;  %s606_s8 = smov [#allocation7]  }
  0x4e   : > { %409 = vmatpush3.msra.mxu0 %v203_v3  ;;  %p532_p11 = pnand %p531_p8, %p803_p3  ;;  %s534_s7 = sshll.u32 %s606_s8, 4  ;;  %s535_s7 = int_to_ptr.vmem [resolvable:$false] %s534_s7 }
  0x4f   : > { %410 = vmatprep.subr.mxu0 %v604_v0  ;;  %s536_s16 = scalar_lea.vmem %s535_s7, 256  ;;  %p537_p10 = scmp.lt.s32.totalorder %s304_s23, %s535_s7 }
  0x50   : > { %411 = vmatpush3.msra.mxu0 %v202_v4  ;;  %p533_p7 = pneg %p532_p11  ;;  %p538_p2 = scmp.lt.s32.totalorder %s536_s16, %s530_s4 }
  0x51   : > { %413 = vmatmul.mubr.msk.f32.vlgmr.msra.gmra.mxu0 %vm213_vm1, %v201_v5 }
  0x52   : > { %p539_p13 = por %p538_p2, %p537_p10 }
  0x54   : > { %p540_p0 = pnand %p539_p13, %p533_p7 }
 0x111   : > { %v283_v7 = vpop.f32.mrf.mxu0 }
 0x112   : > { %v284_v8 = vadd.f32 %v393_v6, %v283_v7 }
 0x113   : > { %v414_v9 = vpop.f32.mrf.mxu0 }
 0x114   : > { %v287_v10 = vadd.f32 %v284_v8, %v201_v5 }
 0x116   : > { %288 = vst.msk [vmem:[%s200_s22] sm:$0xff] %vm213_vm1, %v287_v10 }
 0x117   : > { %543 = shalt.err (!%p540_p0)
}
 0x118   : > { %s544_s9 = scalar_lea.hbm %s301_s29, 128  ;;  %s548_s21 = scalar_lea.hbm %s787_s3, 256 }
 0x119   : > { %p545_p5 = scmp.ne.s32.totalorder %s301_s29, %s544_s9  ;;  %p549_p1 = scmp.lt.s32.totalorder %s301_s29, %s787_s3 }
 0x11a   : > { %p550_p4 = scmp.lt.s32.totalorder %s548_s21, %s544_s9 }
 0x11b   : > { %p546_p9 = pnand %p545_p5, %p803_p3 }
 0x11c   : > { %p551_p6 = por %p550_p4, %p549_p1 }
 0x11d   : > { %p547_p12 = pneg %p546_p9 }
 0x11f   : > { %p552_p8 = pnand %p551_p6, %p547_p12 }
 0x121   : > { %555 = shalt.err (!%p552_p8)
}
 0x122   : > { %421 = dma.vmem_to_hbm [thread:$0]  (%p803_p3), %s304_s23, 128, %s301_s29, %s290_s30  }
 0x123 PF: > { %s315_s18 = sand.u32 1, %s586_s12   ;;  %p804_p11 = scmp.ne.s32.totalorder %s793_s19, 0 }
 0x124   : > { %p805_p7 = scmp.ge.s32.totalorder %s598_s15, 2  ;;  %s316_s20 = scalar_lea.sflag [#allocation4], %s315_s18 }
 0x126   : > { %p432_p10 = pnand %p805_p7, %p804_p11 }
 0x128   : > { %p433_p2 = pneg %p432_p10 }
 0x12a   : > { %581 = dma.done.wait (%p433_p2), %s316_s20, 128  }
 0x12b   : > { %583 = vsyncadd (%p433_p2), %s316_s20, 4294967168  ;;  %p17_p13 = scmp.ge.s32.totalorder %s681_s24, 4   ;;  %s806_s12 = smov %s590_s13 }
 0x12c   : > { %s807_s13 = smov %s594_s14  ;;  %s808_s14 = smov %s698_s5 }
 0x12d   : > { %s809_s15 = smov %s681_s24  ;;  %19 = sbr.rel (!%p17_p13) target bundleno = 6 (0x6), region = 81 }
 0x132   :  { %321 = vsyncpa [#allocation3], 1 }
 0x133   :  { %323 = vsyncpa [#allocation3 + $0x1], 1 }
 0x134   :  { %324 = vsyncpa [#allocation6], 1 }
 0x135   :  { %325 = vsyncpa [#allocation4], 1 }
 0x136   :  { %327 = vsyncpa [#allocation4 + $0x1], 1 }

</bundles_post_ra>
